<compile_context>
chip_gen: v5e
topology: v5e:2x2
jax: 0.10.0
libtpu: 0.0.40
codegen_flags: <defaults>
</compile_context>

<pallas_src>
import functools

import jax
import jax.numpy as jnp
from jax.experimental import pallas as pl
from jax.experimental.pallas import tpu as pltpu


_VMEM_BUDGET_BYTES = 32 * 1024 * 1024   # pipelined working-set target (OK on v7x)
_VMEM_LIMIT_BYTES = 48 * 1024 * 1024    # above the 16/32 MiB default scoped limits


def _choose_tile_n(n, c, num_streams, itemsize):
    """Largest row tile (multiple of 8) whose double-buffered working set fits."""
    # 2 pipeline buffers per input stream of (tile, C) + f32 temporaries.
    per_row = c * (2 * num_streams * itemsize + 4) + 64
    tile = _VMEM_BUDGET_BYTES // per_row
    if tile >= n:
        return n                        # single full-height tile
    # TODO(synk): for C so large that even 8 rows overflow VMEM, add an inner
    # C-tiling pass with online max/sum (flash-softmax style running stats).
    return max(8, (tile // 8) * 8)


# ---------------------------------------------------------------------------
# Self-distillation terms:  sum_k mean_n( sum_c( -softmax(t) * log_softmax(s_k) ) )
# ---------------------------------------------------------------------------
def _sd_distill_kernel(*refs, n_rows, tile_n, num_students):
    i = pl.program_id(0)                     # row-tile index
    t_ref = refs[0]
    s_refs = refs[1:1 + num_students]
    loss_ref = refs[1 + num_students]
    acc_ref = refs[2 + num_students]

    @pl.when(i == 0)
    def _init():
        acc_ref[0] = jnp.float32(0.0)

    # Main-head softmax pieces: computed once per row tile, reused for every
    # shallow head.  softmax itself is never materialized.
    t = t_ref[...].astype(jnp.float32)
    m_t = jnp.max(t, axis=1, keepdims=True)
    e_t = jnp.exp(t - m_t)                                        # (T, C)
    # approx=True -> EUP vrcp slot (otherwise idle here); ~2^-12 rel. error.
    r_zt = pl.reciprocal(jnp.sum(e_t, axis=1, keepdims=True), approx=True)

    # Mask rows past the true N (ragged last tile).
    row = i * tile_n + jax.lax.broadcasted_iota(jnp.int32, (tile_n, 1), 0)
    valid = row < n_rows

    tile_sum = jnp.float32(0.0)
    for s_ref in s_refs:                     # trace-time unroll over heads
        s = s_ref[...].astype(jnp.float32)
        m_s = jnp.max(s, axis=1, keepdims=True)
        s_shift = s - m_s
        lse_s = jnp.log(jnp.sum(jnp.exp(s_shift), axis=1, keepdims=True))  # (T,1)
        # Fused: -sum(softmax(t) * log_softmax(s)) = lse_s - sum(e_t*s_shift)/Z_t
        dot_ts = jnp.sum(e_t * s_shift, axis=1, keepdims=True)             # (T,1)
        per_row = lse_s - dot_ts * r_zt
        tile_sum += jnp.sum(jnp.where(valid, per_row, 0.0))

    acc_ref[0] += tile_sum

    @pl.when(i == pl.num_programs(0) - 1)
    def _finalize():
        loss_ref[0, 0] = acc_ref[0] / jnp.float32(n_rows)


def sd_distill_loss(teacher, students):
    """sum_k mean_n( sum_c( -softmax(teacher) * log_softmax(students[k]) ) )."""
    n, c = teacher.shape
    students = list(students)
    k = len(students)
    assert k >= 1
    for s in students:
        assert s.shape == (n, c)
    itemsize = max(jnp.dtype(teacher.dtype).itemsize,
                   max(jnp.dtype(s.dtype).itemsize for s in students))
    tile_n = _choose_tile_n(n, c, num_streams=1 + k, itemsize=itemsize)
    n_tiles = pl.cdiv(n, tile_n)

    cost = pl.CostEstimate(
        flops=(3 + 6 * k) * n * c,
        transcendentals=(1 + k) * n * c,
        bytes_accessed=(1 + k) * n * c * itemsize + 4,
    )

    block = pl.BlockSpec((tile_n, c), lambda i: (i, 0))
    loss = pl.pallas_call(
        functools.partial(_sd_distill_kernel, n_rows=n, tile_n=tile_n,
                          num_students=k),
        out_shape=jax.ShapeDtypeStruct((1, 1), jnp.float32),
        grid_spec=pltpu.PrefetchScalarGridSpec(
            num_scalar_prefetch=0,
            grid=(n_tiles,),
            in_specs=[block] * (1 + k),
            out_specs=pl.BlockSpec((1, 1), lambda i: (0, 0),
                                   memory_space=pltpu.MemorySpace.SMEM),
            scratch_shapes=[pltpu.SMEM((1,), jnp.float32)],
        ),
        compiler_params=pltpu.CompilerParams(
            dimension_semantics=("arbitrary",),       # scalar accumulation
            vmem_limit_bytes=_VMEM_LIMIT_BYTES,
        ),
        cost_estimate=cost,
    )(teacher, *students)
    return loss[0, 0]


# ---------------------------------------------------------------------------
# NLLLoss dependent class: -mean(sum(log_softmax(x) * (a*onehot + (1-a)/C)))
# ---------------------------------------------------------------------------
def _nll_loss_kernel(x_ref, tgt_ref, alpha_ref, loss_ref, acc_ref, *,
                     n_rows, tile_n, n_classes):
    i = pl.program_id(0)

    @pl.when(i == 0)
    def _init():
        acc_ref[0] = jnp.float32(0.0)

    x = x_ref[...].astype(jnp.float32)
    m = jnp.max(x, axis=1, keepdims=True)
    xs = x - m
    lse = jnp.log(jnp.sum(jnp.exp(xs), axis=1, keepdims=True))            # (T,1)

    cls = jax.lax.broadcasted_iota(jnp.int32, (tile_n, n_classes), 1)
    x_at_t = jnp.sum(jnp.where(cls == tgt_ref[...], xs, 0.0),
                     axis=1, keepdims=True)                               # (T,1)
    sum_xs = jnp.sum(xs, axis=1, keepdims=True)                           # (T,1)
    a = alpha_ref[...].astype(jnp.float32)                                # (T,1)

    # sum(log_softmax(x) * (a*onehot + (1-a)/C))
    #   = a*(x_at_t - lse) + (1-a)*(sum_xs/C - lse)     (fused, no (T,C) temps)
    per_row = a * (x_at_t - lse) + (1.0 - a) * (sum_xs * (1.0 / n_classes) - lse)

    row = i * tile_n + jax.lax.broadcasted_iota(jnp.int32, (tile_n, 1), 0)
    per_row = jnp.where(row < n_rows, per_row, 0.0)
    acc_ref[0] += jnp.sum(per_row)

    @pl.when(i == pl.num_programs(0) - 1)
    def _finalize():
        loss_ref[0, 0] = -acc_ref[0] / jnp.float32(n_rows)


def nll_loss(outputs, targets, alpha=1.0):
    """Pallas NLLLoss: label-smoothed NLL over log_softmax(outputs, dim=1)."""
    n, c = outputs.shape
    tgt = targets.reshape(n, 1).astype(jnp.int32)
    a = jnp.broadcast_to(jnp.asarray(alpha, jnp.float32).reshape(-1, 1), (n, 1))
    itemsize = jnp.dtype(outputs.dtype).itemsize
    tile_n = _choose_tile_n(n, c, num_streams=1, itemsize=itemsize)
    n_tiles = pl.cdiv(n, tile_n)

    cost = pl.CostEstimate(
        flops=8 * n * c,
        transcendentals=n * c,
        bytes_accessed=n * c * itemsize + n * 8 + 4,
    )

    loss = pl.pallas_call(
        functools.partial(_nll_loss_kernel, n_rows=n, tile_n=tile_n, n_classes=c),
        out_shape=jax.ShapeDtypeStruct((1, 1), jnp.float32),
        grid_spec=pltpu.PrefetchScalarGridSpec(
            num_scalar_prefetch=0,
            grid=(n_tiles,),
            in_specs=[
                pl.BlockSpec((tile_n, c), lambda i: (i, 0)),
                pl.BlockSpec((tile_n, 1), lambda i: (i, 0)),
                pl.BlockSpec((tile_n, 1), lambda i: (i, 0)),
            ],
            out_specs=pl.BlockSpec((1, 1), lambda i: (0, 0),
                                   memory_space=pltpu.MemorySpace.SMEM),
            scratch_shapes=[pltpu.SMEM((1,), jnp.float32)],
        ),
        compiler_params=pltpu.CompilerParams(
            dimension_semantics=("arbitrary",),
            vmem_limit_bytes=_VMEM_LIMIT_BYTES,
        ),
        cost_estimate=cost,
    )(outputs, tgt, a)
    return loss[0, 0]


# ---------------------------------------------------------------------------
# SDLoss.forward equivalent
# ---------------------------------------------------------------------------
def sd_loss(outputs, targets, epoch=None, indexs=None, *, criterion=None):
    """Pallas equivalent of SDLoss.forward(outputs, targets, epoch, indexs)."""
    out0 = outputs[0]
    if criterion is not None:
        loss = criterion(out0, targets, indexs)
    else:
        # TODO(synk): SDLoss's `criterion` is injected at construction and is not
        # defined in the spec; default to the NLLLoss dependent class with
        # alpha=1.0 (plain NLL over log_softmax).  `epoch`/`indexs` are unused.
        loss = nll_loss(out0, targets, alpha=1.0)
    # NOTE: the original forward also computes alpha = gather(prob, targets),
    # which is never used (dead code), so it is skipped here.
    if len(outputs) > 1:
        loss = loss + sd_distill_loss(out0, outputs[1:])
    return loss


def sd_loss_ref(outputs, targets):
    """Pure-JAX reference (default NLL criterion + self-distillation terms)."""
    out0 = outputs[0].astype(jnp.float32)
    n, c = out0.shape
    onehot = jax.nn.one_hot(targets, c, dtype=jnp.float32)
    logp0 = jax.nn.log_softmax(out0, axis=1)
    loss = -jnp.mean(jnp.sum(logp0 * onehot, axis=1))
    prob = jax.nn.softmax(out0, axis=-1)
    for o in outputs[1:]:
        logp = jax.nn.log_softmax(o.astype(jnp.float32), axis=-1)
        loss += jnp.mean(jnp.sum(-prob * logp, axis=-1))
    return loss


if __name__ == "__main__":
    key = jax.random.PRNGKey(0)
    k0, k1, k2, kt = jax.random.split(key, 4)
    N, C = 8, 32                     # batch, num_classes (small demo shape)
    out_main = jax.random.normal(k0, (N, C), dtype=jnp.float32)   # deep head
    out_mid1 = jax.random.normal(k1, (N, C), dtype=jnp.float32)   # shallow head 1
    out_mid2 = jax.random.normal(k2, (N, C), dtype=jnp.float32)   # shallow head 2
    targets = jax.random.randint(kt, (N,), 0, C)
    outputs = (out_main, out_mid1, out_mid2)

    loss = jax.block_until_ready(sd_loss(outputs, targets, epoch=0, indexs=None))
    ref = jax.block_until_ready(sd_loss_ref(outputs, targets))

    # Tolerance loosened for pl.reciprocal(approx=True) (~2^-12 relative).
    assert jnp.allclose(loss, ref, atol=1e-2, rtol=1e-2), (loss, ref)
    print("KERNEL_OK")
</pallas_src>

<mosaic_0001>
module attributes {stable_mosaic.version = 11 : i64} {
  func.func @_nll_loss_kernel(%arg0: i32, %arg1: memref<8x32xf32, #tpu.memory_space<vmem>>, %arg2: memref<8x1xi32, #tpu.memory_space<vmem>>, %arg3: memref<8x1xf32, #tpu.memory_space<vmem>>, %arg4: memref<1x1xf32, #tpu.memory_space<smem>>, %arg5: memref<1xf32, #tpu.memory_space<smem>>) attributes {dimension_semantics = [#tpu.dimension_semantics<arbitrary>], iteration_bounds = array<i64: 1>, scalar_prefetch = 0 : i64, scratch_operands = 1 : i64, tpu.core_type = #tpu.core_type<tc>, window_params = [{transform_indices = @transform_0, window_bounds = array<i64: 8, 32>}, {transform_indices = @transform_1, window_bounds = array<i64: 8, 1>}, {transform_indices = @transform_2, window_bounds = array<i64: 8, 1>}, {transform_indices = @transform_3, window_bounds = array<i64: 1, 1>}]} {
    %c0_i32 = arith.constant 0 : i32
    %0 = arith.cmpi eq, %arg0, %c0_i32 : i32
    %1 = arith.extui %0 : i1 to i32
    %c0_i32_0 = arith.constant 0 : i32
    %2 = arith.cmpi ne, %1, %c0_i32_0 : i32
    scf.if %2 {
      %cst_19 = arith.constant 0.000000e+00 : f32
      %c0_20 = arith.constant 0 : index
      %50 = memref.load %arg5[%c0_20] : memref<1xf32, #tpu.memory_space<smem>>
      memref.store %cst_19, %arg5[%c0_20] : memref<1xf32, #tpu.memory_space<smem>>
    } else {
    }
    %c0 = arith.constant 0 : index
    %c0_1 = arith.constant 0 : index
    %3 = vector.load %arg1[%c0, %c0_1] : memref<8x32xf32, #tpu.memory_space<vmem>>, vector<8x32xf32>
    %cst = arith.constant dense<0xFF800000> : vector<8xf32>
    %4 = vector.multi_reduction <maximumf>, %3, %cst [1] : vector<8x32xf32> to vector<8xf32>
    %5 = vector.shape_cast %4 : vector<8xf32> to vector<8x1xf32>
    %6 = vector.broadcast %5 : vector<8x1xf32> to vector<8x32xf32>
    %7 = arith.subf %3, %6 : vector<8x32xf32>
    %8 = math.exp %7 : vector<8x32xf32>
    %cst_2 = arith.constant dense<0.000000e+00> : vector<8xf32>
    %9 = vector.multi_reduction <add>, %8, %cst_2 [1] : vector<8x32xf32> to vector<8xf32>
    %10 = vector.shape_cast %9 : vector<8xf32> to vector<8x1xf32>
    %11 = math.log %10 : vector<8x1xf32>
    %12 = tpu.iota {dimensions = array<i32: 1>} : vector<8x32xi32>
    %c0_3 = arith.constant 0 : index
    %c0_4 = arith.constant 0 : index
    %13 = vector.load %arg2[%c0_3, %c0_4] : memref<8x1xi32, #tpu.memory_space<vmem>>, vector<8x1xi32>
    %14 = vector.broadcast %13 : vector<8x1xi32> to vector<8x32xi32>
    %15 = arith.cmpi eq, %12, %14 : vector<8x32xi32>
    %cst_5 = arith.constant 0.000000e+00 : f32
    %16 = vector.broadcast %cst_5 : f32 to vector<8x32xf32>
    %17 = arith.select %15, %7, %16 : vector<8x32xi1>, vector<8x32xf32>
    %cst_6 = arith.constant dense<0.000000e+00> : vector<8xf32>
    %18 = vector.multi_reduction <add>, %17, %cst_6 [1] : vector<8x32xf32> to vector<8xf32>
    %19 = vector.shape_cast %18 : vector<8xf32> to vector<8x1xf32>
    %cst_7 = arith.constant dense<0.000000e+00> : vector<8xf32>
    %20 = vector.multi_reduction <add>, %7, %cst_7 [1] : vector<8x32xf32> to vector<8xf32>
    %21 = vector.shape_cast %20 : vector<8xf32> to vector<8x1xf32>
    %c0_8 = arith.constant 0 : index
    %c0_9 = arith.constant 0 : index
    %22 = vector.load %arg3[%c0_8, %c0_9] : memref<8x1xf32, #tpu.memory_space<vmem>>, vector<8x1xf32>
    %23 = arith.subf %19, %11 : vector<8x1xf32>
    %24 = arith.mulf %22, %23 : vector<8x1xf32>
    %cst_10 = arith.constant 1.000000e+00 : f32
    %25 = vector.broadcast %cst_10 : f32 to vector<8x1xf32>
    %26 = arith.subf %25, %22 : vector<8x1xf32>
    %cst_11 = arith.constant 3.125000e-02 : f32
    %27 = vector.broadcast %cst_11 : f32 to vector<8x1xf32>
    %28 = arith.mulf %21, %27 : vector<8x1xf32>
    %29 = arith.subf %28, %11 : vector<8x1xf32>
    %30 = arith.mulf %26, %29 : vector<8x1xf32>
    %31 = arith.addf %24, %30 : vector<8x1xf32>
    %c8_i32 = arith.constant 8 : i32
    %32 = arith.muli %arg0, %c8_i32 : i32
    %33 = tpu.iota {dimensions = array<i32: 0>} : vector<8x1xi32>
    %34 = vector.broadcast %32 : i32 to vector<8x1xi32>
    %35 = arith.addi %34, %33 : vector<8x1xi32>
    %c8_i32_12 = arith.constant 8 : i32
    %36 = vector.broadcast %c8_i32_12 : i32 to vector<8x1xi32>
    %37 = arith.cmpi slt, %35, %36 : vector<8x1xi32>
    %cst_13 = arith.constant 0.000000e+00 : f32
    %38 = vector.broadcast %cst_13 : f32 to vector<8x1xf32>
    %39 = arith.select %37, %31, %38 : vector<8x1xi1>, vector<8x1xf32>
    %c0_14 = arith.constant 0 : index
    %40 = memref.load %arg5[%c0_14] : memref<1xf32, #tpu.memory_space<smem>>
    %41 = vector.shape_cast %39 : vector<8x1xf32> to vector<1x8x1xf32>
    %cst_15 = arith.constant dense<0.000000e+00> : vector<1xf32>
    %42 = vector.multi_reduction <add>, %41, %cst_15 [1, 2] : vector<1x8x1xf32> to vector<1xf32>
    %43 = vector.shape_cast %42 : vector<1xf32> to vector<1x1x1xf32>
    %44 = vector.extract %43[0, 0, 0] : f32 from vector<1x1x1xf32>
    %45 = arith.addf %40, %44 : f32
    %c0_16 = arith.constant 0 : index
    %46 = memref.load %arg5[%c0_16] : memref<1xf32, #tpu.memory_space<smem>>
    memref.store %45, %arg5[%c0_16] : memref<1xf32, #tpu.memory_space<smem>>
    %c0_i32_17 = arith.constant 0 : i32
    %47 = arith.cmpi eq, %arg0, %c0_i32_17 : i32
    %48 = arith.extui %47 : i1 to i32
    %c0_i32_18 = arith.constant 0 : i32
    %49 = arith.cmpi ne, %48, %c0_i32_18 : i32
    scf.if %49 {
      %c0_19 = arith.constant 0 : index
      %50 = memref.load %arg5[%c0_19] : memref<1xf32, #tpu.memory_space<smem>>
      %cst_20 = arith.constant 0.000000e+00 : f32
      %51 = arith.subf %cst_20, %50 : f32
      %cst_21 = arith.constant 8.000000e+00 : f32
      %52 = arith.divf %51, %cst_21 : f32
      %c0_22 = arith.constant 0 : index
      %c0_23 = arith.constant 0 : index
      %53 = memref.load %arg4[%c0_22, %c0_23] : memref<1x1xf32, #tpu.memory_space<smem>>
      memref.store %52, %arg4[%c0_22, %c0_23] : memref<1x1xf32, #tpu.memory_space<smem>>
    } else {
    }
    return
  }
  func.func @transform_0(%arg0: i32) -> (i32, i32) {
    %c0_i32 = arith.constant 0 : i32
    %c0_i32_0 = arith.constant 0 : i32
    return %arg0, %c0_i32 : i32, i32
  }
  func.func @transform_1(%arg0: i32) -> (i32, i32) {
    %c0_i32 = arith.constant 0 : i32
    %c0_i32_0 = arith.constant 0 : i32
    return %arg0, %c0_i32 : i32, i32
  }
  func.func @transform_2(%arg0: i32) -> (i32, i32) {
    %c0_i32 = arith.constant 0 : i32
    %c0_i32_0 = arith.constant 0 : i32
    return %arg0, %c0_i32 : i32, i32
  }
  func.func @transform_3(%arg0: i32) -> (i32, i32) {
    %c0_i32 = arith.constant 0 : i32
    %c0_i32_0 = arith.constant 0 : i32
    %c0_i32_1 = arith.constant 0 : i32
    return %c0_i32, %c0_i32_0 : i32, i32
  }
}

</mosaic_0001>

<bundles_post_ra>
// kernel: tpu_custom_call.1
= control target key start
LH: loop header
LB: loop body
LE: loop exit
PB: predicated region body
PF: predicated region fallthrough
CT: control target
= control target key end

     0   :  { %vm22_vm0 = vcmask 261120   ;;  %s176_s0 = inlined_call_operand.vmem [shape: f32[8,32], index: 0, kind: input, shape index: {}]   ;;  %s177_s1 = inlined_call_operand.vmem [shape: s32[8,1], index: 1, kind: input, shape index: {}]   ;;  %s178_s2 = inlined_call_operand.vmem [shape: f32[8,1], index: 2, kind: input, shape index: {}]   ;;  %s179_s3 = inlined_call_operand.hbm [shape: f32[1,1], index: 3, kind: output, shape index: {}]  }
   0x1   :  { %v21_v0 = vld [vmem:[%s176_s0] sm:$0xff] }
   0x2   :  { %8 = vsyncpa [#allocation4], 0  ;;  %v23_v1 = vsel %vm22_vm0, %v21_v0, -inf  ;;  %v137_v2 = vmov 0   ;;  %v36_v3 = vld [vmem:[%s177_s1] sm:$0xff]  ;;  %v34_v9 = vlaneseq  ;;  %vm64_vm2 = vcmask 7168  }
   0x3   :  { %116 = vset.pattern.permute.xlu0 %v137_v2  ;;  %v48_v16 = vld [vmem:[%s178_s2] sm:$0xff]  ;;  %v138_v29 = vmov 8.0   ;;  %s99_s17 = sshll.u32 %s179_s3, 4  ;;  %s139_s22 = smov [#allocation3]   ;;  %s100_s17 = int_to_ptr.hbm [resolvable:$true] %s99_s17 }
   0x4   :  { %24 = vmax.xlane.f32.xlu0 %v23_v1  ;;  %v35_v10 = vand.u32 127, %v34_v9  ;;  %v51_v21 = vsub.f32 1.0, %v48_v16 }
  0x18   :  { %38 = vperm.xlu0 %116, %v36_v3  }
  0x77   :  { %v25_v4 = vpop.xlane.xlu0 %24 }
  0x78   :  { %v26_v5 = vsub.f32 %v21_v0, %v25_v4 }
  0x7a   :  { %v27_v6 = vmul.f32 1.442695, %v26_v5  ;;  %v45_v12 = vsel %vm22_vm0, %v26_v5, 0.0 }
  0x7c   :  { %117 = vpow2.f32 %v27_v6 }
  0x82   :  { %v118_v7 = vpop.eup %117 }
  0x83   :  { %v29_v8 = vsel %vm22_vm0, %v118_v7, 0.0 }
  0x84   :  { %30 = vadd.xlane.f32.xlu1 %v29_v8 }
  0x8a   :  { %v39_v11 = vpop.permute.xlu0 %38 }
  0x8b   :  { %vm40_vm1 = vcmp.eq.s32.totalorder %v35_v10, %v39_v11 }
  0x8c   :  { %46 = vadd.xlane.f32.xlu1 %v45_v12  ;;  %v41_v13 = vsel %vm40_vm1, %v26_v5, 0.0 }
  0x8d   :  { %v42_v14 = vsel %vm22_vm0, %v41_v13, 0.0 }
  0x8e   :  { %43 = vadd.xlane.f32.xlu2 %v42_v14 }
  0xf7   :  { %v31_v15 = vpop.xlane.xlu1 %30 }
  0xf8   :  { %119 = vlog2.f32 %v31_v15 }
  0xf9   :  { %121 = vrcp.f32 %v138_v29 }
  0xfe   :  { %v120_v17 = vpop.eup %119 }
  0xff   :  { %v33_v18 = vmul.f32 0.6931472, %v120_v17  ;;  %v47_v19 = vpop.xlane.xlu1 %46  ;;  %v122_v30 = vpop.eup %121 }
 0x100   :  { %v52_v20 = vmul.f32 0.03125, %v47_v19  ;;  %v84_v31 = vmul.f32 8.0, %v122_v30  ;;  %vm88_vm3 = vweird.f32 %v122_v30 }
 0x101   :  { %v44_v22 = vpop.xlane.xlu2 %43 }
 0x102   :  { %v53_v23 = vsub.f32 %v52_v20, %v33_v18  ;;  %v49_v24 = vsub.f32 %v44_v22, %v33_v18  ;;  %v85_v32 = vsub.f32 1.0, %v84_v31 }
 0x104   :  { %v50_v25 = vmul.f32 %v49_v24, %v48_v16  ;;  %v54_v26 = vmul.f32 %v53_v23, %v51_v21  ;;  %v86_v36 = vmul.f32 %v122_v30, %v85_v32 }
 0x106   :  { %v55_v27 = vadd.f32 %v54_v26, %v50_v25  ;;  %v87_v39 = vadd.f32 %v122_v30, %v86_v36 }
 0x108   :  { %v65_v28 = vsel %vm64_vm2, %v55_v27, 0.0  ;;  %v89_v42 = vsel %vm88_vm3, %v122_v30, %v87_v39 }
 0x109   :  { %66 = vadd.xlane.f32.xlu2 %v65_v28 }
 0x17c   :  { %v67_v33 = vpop.xlane.xlu2 %66 }
 0x17d   :  { %v68_v34 = vrot.slane %v67_v33, 4 }
 0x17f   :  { %v69_v35 = vadd.f32 %v68_v34, %v67_v33 }
 0x181   :  { %v70_v37 = vrot.slane %v69_v35, 2 }
 0x183   :  { %v71_v38 = vadd.f32 %v70_v37, %v69_v35 }
 0x185   :  { %v72_v40 = vrot.slane %v71_v38, 1 }
 0x187   :  { %v73_v41 = vadd.f32 %v72_v40, %v71_v38 }
 0x189   :  { %109 = vpush %v73_v41 }
 0x18a   :  { %111 = vpush %v89_v42 }
 0x1ba   :  { %s110_s18 = spop %109 }
 0x1bb   :  { %s82_s19 = ssub.f32 0.0, %s110_s18  ;;  %s112_s20 = spop %111 }
 0x1bd   :  { %s91_s21 = smul.f32 %s112_s20, %s82_s19 }
 0x1bf   :  { %93 = sst [smem:[#allocation3]] %s91_s21 }
 0x1c0   :  { %102 = dma.smem_to_hbm %s139_s22, 16, %s100_s17, [#allocation4]  }
 0x1c1   :  { %135 = dma.done.wait [#allocation4], 16  }
 0x1c2   :  { %136 = vsyncadd [#allocation4], 4294967280 }
 0x1c3   :  { %107 = sfence }
 0x1c4   :  { %108 = vsyncpa [#allocation4], 1 }

</bundles_post_ra>
